<compile_context>
chip_gen: v5e
topology: v5e:2x2
jax: 0.10.0
libtpu: 0.0.40
codegen_flags: <defaults>
</compile_context>

<pallas_src>
import numpy as np
import jax
import jax.numpy as jnp
from jax.experimental import pallas as pl
from jax.experimental.pallas import tpu as pltpu


def _conv1x1_kernel(x_ref, w_ref, o_ref):
    # One (TM, Cp) tile of packed activations @ resident (Cp, Cp) block-diagonal
    # weight -> (TM, Cp) output tile.  f32 accumulation on the MXU.
    o_ref[...] = jnp.dot(
        x_ref[...], w_ref[...], preferred_element_type=jnp.float32
    ).astype(o_ref.dtype)


def _round_up(x, m):
    return ((x + m - 1) // m) * m


def invertible_conv1x1_forward(x, weight, logdet=None, seq_len=1, *,
                               tile_rows=2048, use_bf16=False):
    """Forward pass of InvertibleConv1x1 (LU_decomposed=False, reverse=False).

    x:      (B, T, C) float32
    weight: (C, C)    float32
    logdet: optional (B,) float32
    Returns (z, logdet) matching the PyTorch semantics:
        z      = x @ weight                       (matmul over last dim)
        logdet = logdet + slogdet(W)[1] * T * seq_len
    If use_bf16=True, activations/weight/output are bf16 (f32 MXU accumulation);
    ~2x less HBM traffic but does not meet a 1e-5 tolerance.
    """
    B, T, C = x.shape
    M = B * T

    # ---- Lane packing / padding policy (keep output lane-dense). ------------
    if C < 128 and 128 % C == 0:
        k, Cp, c_pad = 128 // C, 128, 0          # fold k rows into 128 lanes
    elif C % 128 == 0:
        k, Cp, c_pad = 1, C, 0                   # already lane-dense
    else:
        k, Cp = 1, _round_up(C, 128)             # pad channels to 128-multiple
        c_pad = Cp - C

    compute_dtype = jnp.bfloat16 if use_bf16 else x.dtype

    x2d = x.reshape(M, C)
    if c_pad:
        x2d = jnp.pad(x2d, ((0, 0), (0, c_pad)))

    # Only the tiny pad needed to fold rows by k (<= k-1 rows, usually zero).
    Mp = pl.cdiv(M, k)                           # packed row count
    row_pad = Mp * k - M
    if row_pad:
        x2d = jnp.pad(x2d, ((0, row_pad), (0, 0)))
    x_packed = x2d.reshape(Mp, Cp).astype(compute_dtype)

    # Block-diagonal weight kron(I_k, W): each folded row multiplied by W
    # independently. Zero-padded channels get zero weight rows/cols (inert).
    if k > 1:
        w_block = jnp.kron(jnp.eye(k, dtype=weight.dtype), weight)
    elif c_pad:
        w_block = jnp.pad(weight, ((0, c_pad), (0, c_pad)))
    else:
        w_block = weight
    w_block = w_block.astype(compute_dtype)

    # ---- Row-tile sizing. ----------------------------------------------------
    TM = _round_up(min(tile_rows, Mp), 8)
    TM = min(TM, 4096)   # 2 in + 2 out buffers stay under v5e's 16 MiB scoped VMEM
    num_tiles = pl.cdiv(Mp, TM)
    # v7x has 2 TensorCores: prefer an even tile count so "parallel" splits evenly.
    if num_tiles > 1 and num_tiles % 2 == 1:
        num_tiles += 1
        TM = _round_up(pl.cdiv(Mp, num_tiles), 8)
    grid = (pl.cdiv(Mp, TM),)                    # ragged last block is OK

    elem = jnp.dtype(compute_dtype).itemsize
    cost = pl.CostEstimate(
        flops=2 * Mp * Cp * Cp,
        transcendentals=0,
        bytes_accessed=elem * (2 * Mp * Cp + Cp * Cp),
    )

    z_packed = pl.pallas_call(
        _conv1x1_kernel,
        out_shape=jax.ShapeDtypeStruct((Mp, Cp), compute_dtype),
        grid_spec=pltpu.PrefetchScalarGridSpec(
            num_scalar_prefetch=0,
            grid=grid,
            in_specs=[
                pl.BlockSpec((TM, Cp), lambda i: (i, 0)),   # row tile, pipelined
                # Constant index_map: weight DMA'd once and kept resident.
                pl.BlockSpec((Cp, Cp), lambda i: (0, 0)),
            ],
            out_specs=pl.BlockSpec((TM, Cp), lambda i: (i, 0)),
        ),
        compiler_params=pltpu.CompilerParams(
            dimension_semantics=("parallel",),   # shard row tiles across TCs (v7x)
        ),
        cost_estimate=cost,
    )(x_packed, w_block)

    # ---- Unpack (free reshapes when no padding was needed). -------------------
    if k > 1:
        z2d = z_packed.reshape(Mp * k, C)
        if row_pad:
            z2d = z2d[:M]
    else:
        z2d = z_packed if not c_pad else z_packed[:, :C]
    z = z2d.reshape(B, T, C)

    # dlogdet = slogdet(W)[1] * input.size(1); tiny CxC factorization.
    # TODO(synk): slogdet (LU of the CxC weight) has no clean Pallas equivalent;
    # it stays on the XLA side.
    dlogdet = jnp.linalg.slogdet(weight)[1] * T
    if logdet is not None:
        logdet = logdet + dlogdet * seq_len
    return z, logdet


if __name__ == "__main__":
    num_channels = 32
    B, T = 2, 16
    seq_len = 1

    key = jax.random.PRNGKey(0)
    kw, kx, kl = jax.random.split(key, 3)

    # Deterministic orthogonal init, same recipe as the module: QR of a random
    # normal matrix of shape [num_channels, num_channels].
    w_rand = jax.random.normal(kw, (num_channels, num_channels), dtype=jnp.float32)
    weight, _ = jnp.linalg.qr(w_rand)
    weight = weight.astype(jnp.float32)

    x = jax.random.normal(kx, (B, T, num_channels), dtype=jnp.float32)
    logdet0 = jax.random.normal(kl, (B,), dtype=jnp.float32)

    z, logdet = invertible_conv1x1_forward(x, weight, logdet=logdet0, seq_len=seq_len)
    jax.block_until_ready(z)
    jax.block_until_ready(logdet)

    # Reference check against plain JAX.
    z_ref = jnp.matmul(x, weight)
    logdet_ref = logdet0 + jnp.linalg.slogdet(weight)[1] * T * seq_len
    np.testing.assert_allclose(np.asarray(z), np.asarray(z_ref), rtol=1e-5, atol=1e-5)
    np.testing.assert_allclose(
        np.asarray(logdet), np.asarray(logdet_ref), rtol=1e-5, atol=1e-5
    )

    print("KERNEL_OK")
</pallas_src>

<mosaic_0001>
module attributes {stable_mosaic.version = 11 : i64} {
  func.func @_conv1x1_kernel(%arg0: i32, %arg1: memref<8x128xf32, #tpu.memory_space<vmem>>, %arg2: memref<128x128xf32, #tpu.memory_space<vmem>>, %arg3: memref<8x128xf32, #tpu.memory_space<vmem>>) attributes {dimension_semantics = [#tpu.dimension_semantics<parallel>], iteration_bounds = array<i64: 1>, scalar_prefetch = 0 : i64, scratch_operands = 0 : i64, tpu.core_type = #tpu.core_type<tc>, window_params = [{transform_indices = @transform_0, window_bounds = array<i64: 8, 128>}, {pipeline_mode = #tpu.pipeline_mode<synchronous>, transform_indices = @transform_1, window_bounds = array<i64: 128, 128>}, {transform_indices = @transform_2, window_bounds = array<i64: 8, 128>}]} {
    %c0 = arith.constant 0 : index
    %c0_0 = arith.constant 0 : index
    %0 = vector.load %arg1[%c0, %c0_0] : memref<8x128xf32, #tpu.memory_space<vmem>>, vector<8x128xf32>
    %c0_1 = arith.constant 0 : index
    %c0_2 = arith.constant 0 : index
    %1 = vector.load %arg2[%c0_1, %c0_2] : memref<128x128xf32, #tpu.memory_space<vmem>>, vector<128x128xf32>
    %cst = arith.constant dense<0.000000e+00> : vector<8x128xf32>
    %2 = tpu.matmul %0, %1, %cst {dimension_numbers = #tpu.dot_dimension_numbers<[1], [0], [0], [1], [0, 0, 1, 1], [], []>} : vector<8x128xf32>, vector<128x128xf32>, vector<8x128xf32> -> vector<8x128xf32>
    %c0_3 = arith.constant 0 : index
    %c0_4 = arith.constant 0 : index
    %3 = vector.load %arg3[%c0_3, %c0_4] : memref<8x128xf32, #tpu.memory_space<vmem>>, vector<8x128xf32>
    tpu.vector_store %arg3[%c0_3, %c0_4], %2 {strides = array<i32>} : memref<8x128xf32, #tpu.memory_space<vmem>>, vector<8x128xf32>,
    return
  }
  func.func @transform_0(%arg0: i32) -> (i32, i32) {
    %c0_i32 = arith.constant 0 : i32
    %c0_i32_0 = arith.constant 0 : i32
    return %arg0, %c0_i32 : i32, i32
  }
  func.func @transform_1(%arg0: i32) -> (i32, i32) {
    %c0_i32 = arith.constant 0 : i32
    %c0_i32_0 = arith.constant 0 : i32
    %c0_i32_1 = arith.constant 0 : i32
    return %c0_i32, %c0_i32_0 : i32, i32
  }
  func.func @transform_2(%arg0: i32) -> (i32, i32) {
    %c0_i32 = arith.constant 0 : i32
    %c0_i32_0 = arith.constant 0 : i32
    return %arg0, %c0_i32 : i32, i32
  }
}

</mosaic_0001>

<bundles_post_ra>
// kernel: tpu_custom_call.1
= control target key start
LH: loop header
LB: loop body
LE: loop exit
PB: predicated region body
PF: predicated region fallthrough
CT: control target
= control target key end

     0   :  { %7 = vsyncpa [#allocation3], 0  ;;  %s210_s0 = inlined_call_operand.hbm [shape: f32[8,128], index: 0, kind: input, shape index: {}]   ;;  %s211_s1 = inlined_call_operand.hbm [shape: f32[128,128], index: 1, kind: input, shape index: {}]   ;;  %s212_s2 = inlined_call_operand.hbm [shape: f32[8,128], index: 2, kind: output, shape index: {}]  }
   0x1   :  { %8 = vsyncpa [#allocation6], 0 }
   0x2   :  { %9 = vsyncpa [#allocation4], 0  ;;  %s15_s11 = sshll.u32 %s210_s0, 4  ;;  %s181_s12 = smov [#allocation2]   ;;  %s16_s11 = int_to_ptr.hbm [resolvable:$true] %s15_s11 }
   0x3   :  { %s17_s13 = sshll.u32 %s181_s12, 4  ;;  %s25_s16 = sshll.u32 %s211_s1, 4  ;;  %s18_s13 = int_to_ptr.vmem [resolvable:$true] %s17_s13  ;;  %s26_s16 = int_to_ptr.hbm [resolvable:$true] %s25_s16 }
   0x4   :  { %20 = dma.hbm_to_vmem [thread:$0]  %s16_s11, 128, %s18_s13, [#allocation3]  }
   0x5   :  { %s182_s17 = smov [#allocation5]   ;;  %s183_s19 = smov 128  }
   0x6   :  { %s27_s18 = sshll.u32 %s182_s17, 4  ;;  %s184_s20 = smov 8   ;;  %s28_s18 = int_to_ptr.vmem [resolvable:$true] %s27_s18 }
   0x7   :  { %33 = dma.hbm_to_vmem [thread:$0]  %s26_s16, 2048, %s28_s18, [#allocation6], %s183_s19, %s183_s19, %s184_s20  }
   0x8   :  { %175 = dma.done.wait [#allocation3], 128  }
   0x9   :  { %176 = vsyncadd [#allocation3], 4294967168 }
   0xa   :  { %177 = dma.done.wait [#allocation6], 2048  }
   0xb   :  { %178 = vsyncadd [#allocation6], 4294965248  ;;  %v58_v0 = vld [vmem:[#allocation5 + $0x78] sm:$0xff]  ;;  %v57_v1 = vld [vmem:[#allocation5 + $0x70] sm:$0xff]  ;;  %s185_s0 = smov [#allocation7]   ;;  %s87_s23 = sshll.u32 %s212_s2, 4  ;;  %s88_s23 = int_to_ptr.hbm [resolvable:$true] %s87_s23 }
   0xc   :  { %59 = vmatpush.msra.mxu0 %v58_v0  ;;  %v56_v2 = vld [vmem:[#allocation5 + $0x68] sm:$0xff]  ;;  %v55_v3 = vld [vmem:[#allocation5 + $0x60] sm:$0xff]  ;;  %v54_v4 = vld [vmem:[#allocation5 + $0x58] sm:$0xff]  ;;  %s85_s1 = sshll.u32 %s185_s0, 4  ;;  %s86_s1 = int_to_ptr.vmem [resolvable:$true] %s85_s1 }
   0xd   :  { %v53_v5 = vld [vmem:[#allocation5 + $0x50] sm:$0xff]  ;;  %v52_v6 = vld [vmem:[#allocation5 + $0x48] sm:$0xff]  ;;  %v51_v7 = vld [vmem:[#allocation5 + $0x40] sm:$0xff] }
   0xe   :  { %60 = vmatpush.msra.mxu0 %v57_v1  ;;  %v50_v8 = vld [vmem:[#allocation5 + $0x38] sm:$0xff]  ;;  %v49_v9 = vld [vmem:[#allocation5 + $0x30] sm:$0xff]  ;;  %v48_v10 = vld [vmem:[#allocation5 + $0x28] sm:$0xff] }
   0xf   :  { %v47_v11 = vld [vmem:[#allocation5 + $0x20] sm:$0xff]  ;;  %v46_v12 = vld [vmem:[#allocation5 + $0x18] sm:$0xff]  ;;  %v45_v13 = vld [vmem:[#allocation5 + $0x10] sm:$0xff] }
  0x10   :  { %61 = vmatpush.msra.mxu0 %v56_v2  ;;  %v44_v14 = vld [vmem:[#allocation5 + $0x8] sm:$0xff]  ;;  %v43_v15 = vld [vmem:[#allocation5] sm:$0xff]  ;;  %v42_v16 = vld [vmem:[#allocation2] sm:$0xff] }
  0x12   :  { %62 = vmatpush.msra.mxu0 %v55_v3 }
  0x14   :  { %63 = vmatpush.msra.mxu0 %v54_v4 }
  0x16   :  { %64 = vmatpush.msra.mxu0 %v53_v5 }
  0x18   :  { %65 = vmatpush.msra.mxu0 %v52_v6 }
  0x1a   :  { %66 = vmatpush.msra.mxu0 %v51_v7 }
  0x1c   :  { %67 = vmatpush.msra.mxu0 %v50_v8 }
  0x1e   :  { %68 = vmatpush.msra.mxu0 %v49_v9 }
  0x20   :  { %69 = vmatpush.msra.mxu0 %v48_v10 }
  0x22   :  { %70 = vmatpush.msra.mxu0 %v47_v11 }
  0x24   :  { %71 = vmatpush.msra.mxu0 %v46_v12 }
  0x26   :  { %72 = vmatpush.msra.mxu0 %v45_v13 }
  0x28   :  { %73 = vmatpush.msra.mxu0 %v44_v14 }
  0x2a   :  { %74 = vmatpush.msra.mxu0 %v43_v15 }
  0x2b   :  { %75 = vmatmul.f32.vlgmr.msra.gmra.mxu0 %v42_v16 }
  0xa8   :  { %v76_v17 = vpop.f32.mrf.mxu0 }
  0xa9   :  { %79 = vst [vmem:[#allocation7] sm:$0xff] %v76_v17 }
  0xaa   :  { %90 = dma.vmem_to_hbm [thread:$0]  %s86_s1, 128, %s88_s23, [#allocation4]  }
  0xab   :  { %179 = dma.done.wait [#allocation4], 128  }
  0xac   :  { %180 = vsyncadd [#allocation4], 4294967168 }
  0xad   :  { %95 = vsyncpa [#allocation3], 1 }
  0xae   :  { %96 = vsyncpa [#allocation6], 1 }
  0xaf   :  { %97 = vsyncpa [#allocation4], 1 }

</bundles_post_ra>
